<compile_context>
chip_gen: v6e
topology: v6e:2x2x1
jax: 0.10.0
libtpu: 0.0.40
codegen_flags: <defaults>
</compile_context>

<pallas_src>
import functools

import jax
import jax.numpy as jnp
from jax import lax
from jax.experimental import pallas as pl
from jax.experimental.pallas import tpu as pltpu

EPS = 1e-5


# ---------------------------------------------------------------------------
# Tile sizing
# ---------------------------------------------------------------------------
def _row_tile(rows: int, C: int, itemsize: int) -> int:
    """Rows per block: multiple of 8, ~<=1 MiB per x block, or full extent."""
    if rows <= 8:
        return rows  # full-extent block (allowed regardless of (8,128) rule)
    bytes_per_row = C * max(itemsize, 4)  # f32 intermediates dominate
    tm = (1 << 20) // bytes_per_row
    tm = max(8, min(1024, (tm // 8) * 8))
    if tm >= rows:
        return rows  # single block covering the whole array
    return tm


# ---------------------------------------------------------------------------
# Kernels
# ---------------------------------------------------------------------------
def _ln_kernel(x_ref, g_ref, b_ref, o_ref):
    # x_ref: [TM, C] row tile — LayerNorm over last dim (C) per row (token).
    x = x_ref[...].astype(jnp.float32)
    mean = jnp.mean(x, axis=-1, keepdims=True)
    xc = x - mean
    var = jnp.mean(xc * xc, axis=-1, keepdims=True)
    inv = lax.rsqrt(var + EPS)
    y = xc * (inv * g_ref[...].astype(jnp.float32)) + b_ref[...].astype(jnp.float32)
    o_ref[...] = y.astype(o_ref.dtype)


def _bn_stats_kernel(x_ref, o_ref, *, rows, tm):
    # Pass 1: accumulate per-channel sum / sum-of-squares over row tiles.
    # o_ref: [2, C] f32 (row 0 = sum, row 1 = sum of squares); same output
    # block across all grid steps -> resident accumulator.
    i = pl.program_id(0)

    @pl.when(i == 0)
    def _init():
        o_ref[...] = jnp.zeros_like(o_ref)

    x = x_ref[...].astype(jnp.float32)
    if rows % tm != 0:
        # Mask out-of-range rows in the (only) partial tile.
        row_ids = i * tm + lax.broadcasted_iota(jnp.int32, x.shape, 0)
        x = jnp.where(row_ids < rows, x, 0.0)

    s = jnp.sum(x, axis=0, keepdims=True)
    ss = jnp.sum(x * x, axis=0, keepdims=True)
    o_ref[0:1, :] = o_ref[0:1, :] + s
    o_ref[1:2, :] = o_ref[1:2, :] + ss


def _bn_apply_kernel(x_ref, a_ref, b_ref, o_ref):
    # Pass 2: y = x * a + b with per-channel fused scale/shift (a, b are [1, C]).
    x = x_ref[...].astype(jnp.float32)
    o_ref[...] = (x * a_ref[...] + b_ref[...]).astype(o_ref.dtype)


# ---------------------------------------------------------------------------
# Wrapper
# ---------------------------------------------------------------------------
@functools.partial(jax.jit, static_argnames=("name",))
def token_norm(x, gamma, beta, *, name):
    """TokenNorm.forward.

    x:     [B, N, C]
    gamma: [C]   (norm weight)
    beta:  [C]   (norm bias)
    name:  norm name string; contains 'ln' -> LayerNorm over C,
           otherwise -> BatchNorm2d-style per-channel norm over (B*N)
           (training-mode batch statistics).
    """
    B, N, C = x.shape
    rows = B * N
    x2 = x.reshape(rows, C)
    tm = _row_tile(rows, C, x.dtype.itemsize)
    grid = (pl.cdiv(rows, tm),)

    if "ln" in name:
        g2 = gamma.reshape(1, C)
        b2 = beta.reshape(1, C)
        out2 = pl.pallas_call(
            _ln_kernel,
            out_shape=jax.ShapeDtypeStruct((rows, C), x.dtype),
            grid=grid,
            in_specs=[
                pl.BlockSpec((tm, C), lambda i: (i, 0)),
                pl.BlockSpec((1, C), lambda i: (0, 0)),  # resident across steps
                pl.BlockSpec((1, C), lambda i: (0, 0)),
            ],
            out_specs=pl.BlockSpec((tm, C), lambda i: (i, 0)),
            compiler_params=pltpu.CompilerParams(
                dimension_semantics=("parallel",)
            ),
        )(x2, g2, b2)
        return out2.reshape(B, N, C)

    # ---- BN path: pass 1, per-channel statistics -------------------------
    stats = pl.pallas_call(
        functools.partial(_bn_stats_kernel, rows=rows, tm=tm),
        out_shape=jax.ShapeDtypeStruct((2, C), jnp.float32),
        grid=grid,
        in_specs=[pl.BlockSpec((tm, C), lambda i: (i, 0))],
        out_specs=pl.BlockSpec((2, C), lambda i: (0, 0)),  # accumulator block
        compiler_params=pltpu.CompilerParams(
            dimension_semantics=("arbitrary",)
        ),
    )(x2)

    # Tiny per-channel finalize (fused scale/shift), done once in plain JAX.
    n = jnp.float32(rows)
    mean = stats[0] / n
    var = jnp.maximum(stats[1] / n - mean * mean, 0.0)
    inv = lax.rsqrt(var + EPS)
    a = (gamma.astype(jnp.float32) * inv).reshape(1, C)
    b = (beta.astype(jnp.float32) - mean * gamma.astype(jnp.float32) * inv).reshape(1, C)

    # ---- BN path: pass 2, tiled elementwise normalize ---------------------
    out2 = pl.pallas_call(
        _bn_apply_kernel,
        out_shape=jax.ShapeDtypeStruct((rows, C), x.dtype),
        grid=grid,
        in_specs=[
            pl.BlockSpec((tm, C), lambda i: (i, 0)),
            pl.BlockSpec((1, C), lambda i: (0, 0)),
            pl.BlockSpec((1, C), lambda i: (0, 0)),
        ],
        out_specs=pl.BlockSpec((tm, C), lambda i: (i, 0)),
        compiler_params=pltpu.CompilerParams(
            dimension_semantics=("parallel",)
        ),
    )(x2, a, b)
    return out2.reshape(B, N, C)
    # TODO(synk): running-mean/var tracking and eval() mode of BatchNorm2d are
    # not implemented; this is the training-mode batch-statistics forward only.


# ---------------------------------------------------------------------------
# Pure-JAX references (for verification)
# ---------------------------------------------------------------------------
def _ref_ln(x, gamma, beta):
    xf = x.astype(jnp.float32)
    mean = jnp.mean(xf, axis=-1, keepdims=True)
    var = jnp.mean((xf - mean) ** 2, axis=-1, keepdims=True)
    return ((xf - mean) * lax.rsqrt(var + EPS) * gamma + beta).astype(x.dtype)


def _ref_bn(x, gamma, beta):
    xf = x.astype(jnp.float32)
    mean = jnp.mean(xf, axis=(0, 1), keepdims=True)
    var = jnp.mean((xf - mean) ** 2, axis=(0, 1), keepdims=True)
    return ((xf - mean) * lax.rsqrt(var + EPS) * gamma + beta).astype(x.dtype)


# ---------------------------------------------------------------------------
if __name__ == "__main__":
    key = jax.random.PRNGKey(0)
    kx, kg, kb = jax.random.split(key, 3)

    B, N, C = 2, 8, 32  # batch, tokens, channels
    x = jax.random.normal(kx, (B, N, C), dtype=jnp.float32)
    # Deterministic, non-trivial norm parameters (norm.weight / norm.bias).
    gamma = 1.0 + 0.1 * jax.random.normal(kg, (C,), dtype=jnp.float32)
    beta = 0.1 * jax.random.normal(kb, (C,), dtype=jnp.float32)

    # 'ln' path (e.g. norm name "ln")
    y_ln = token_norm(x, gamma, beta, name="ln")
    jax.block_until_ready(y_ln)
    assert jnp.allclose(y_ln, _ref_ln(x, gamma, beta), atol=1e-5, rtol=1e-5)

    # non-'ln' path (e.g. norm name "bn" -> BatchNorm2d over NCHW-permuted x)
    y_bn = token_norm(x, gamma, beta, name="bn")
    jax.block_until_ready(y_bn)
    assert jnp.allclose(y_bn, _ref_bn(x, gamma, beta), atol=1e-5, rtol=1e-5)

    print("KERNEL_OK")
</pallas_src>

<mosaic_0001>
module attributes {stable_mosaic.version = 11 : i64} {
  func.func @_ln_kernel(%arg0: i32, %arg1: memref<16x32xf32, #tpu.memory_space<vmem>>, %arg2: memref<1x32xf32, #tpu.memory_space<vmem>>, %arg3: memref<1x32xf32, #tpu.memory_space<vmem>>, %arg4: memref<16x32xf32, #tpu.memory_space<vmem>>) attributes {dimension_semantics = [#tpu.dimension_semantics<parallel>], iteration_bounds = array<i64: 1>, scalar_prefetch = 0 : i64, scratch_operands = 0 : i64, tpu.core_type = #tpu.core_type<tc>, window_params = [{transform_indices = @transform_0, window_bounds = array<i64: 16, 32>}, {pipeline_mode = #tpu.pipeline_mode<synchronous>, transform_indices = @transform_1, window_bounds = array<i64: 1, 32>}, {pipeline_mode = #tpu.pipeline_mode<synchronous>, transform_indices = @transform_2, window_bounds = array<i64: 1, 32>}, {transform_indices = @transform_3, window_bounds = array<i64: 16, 32>}]} {
    %c0 = arith.constant 0 : index
    %c0_0 = arith.constant 0 : index
    %0 = vector.load %arg1[%c0, %c0_0] : memref<16x32xf32, #tpu.memory_space<vmem>>, vector<16x32xf32>
    %cst = arith.constant dense<0.000000e+00> : vector<16xf32>
    %1 = vector.multi_reduction <add>, %0, %cst [1] : vector<16x32xf32> to vector<16xf32>
    %2 = vector.shape_cast %1 : vector<16xf32> to vector<16x1xf32>
    %cst_1 = arith.constant 3.200000e+01 : f32
    %3 = vector.broadcast %cst_1 : f32 to vector<16x1xf32>
    %4 = arith.divf %2, %3 : vector<16x1xf32>
    %5 = vector.broadcast %4 : vector<16x1xf32> to vector<16x32xf32>
    %6 = arith.subf %0, %5 : vector<16x32xf32>
    %7 = arith.mulf %6, %6 : vector<16x32xf32>
    %cst_2 = arith.constant dense<0.000000e+00> : vector<16xf32>
    %8 = vector.multi_reduction <add>, %7, %cst_2 [1] : vector<16x32xf32> to vector<16xf32>
    %9 = vector.shape_cast %8 : vector<16xf32> to vector<16x1xf32>
    %cst_3 = arith.constant 3.200000e+01 : f32
    %10 = vector.broadcast %cst_3 : f32 to vector<16x1xf32>
    %11 = arith.divf %9, %10 : vector<16x1xf32>
    %cst_4 = arith.constant 9.99999974E-6 : f32
    %12 = vector.broadcast %cst_4 : f32 to vector<16x1xf32>
    %13 = arith.addf %11, %12 : vector<16x1xf32>
    %14 = math.rsqrt %13 : vector<16x1xf32>
    %c0_5 = arith.constant 0 : index
    %c0_6 = arith.constant 0 : index
    %15 = vector.load %arg2[%c0_5, %c0_6] : memref<1x32xf32, #tpu.memory_space<vmem>>, vector<1x32xf32>
    %16 = vector.broadcast %14 : vector<16x1xf32> to vector<16x32xf32>
    %17 = vector.broadcast %15 : vector<1x32xf32> to vector<16x32xf32>
    %18 = arith.mulf %16, %17 : vector<16x32xf32>
    %19 = arith.mulf %6, %18 : vector<16x32xf32>
    %c0_7 = arith.constant 0 : index
    %c0_8 = arith.constant 0 : index
    %20 = vector.load %arg3[%c0_7, %c0_8] : memref<1x32xf32, #tpu.memory_space<vmem>>, vector<1x32xf32>
    %21 = vector.broadcast %20 : vector<1x32xf32> to vector<16x32xf32>
    %22 = arith.addf %19, %21 : vector<16x32xf32>
    %c0_9 = arith.constant 0 : index
    %c0_10 = arith.constant 0 : index
    %23 = vector.load %arg4[%c0_9, %c0_10] : memref<16x32xf32, #tpu.memory_space<vmem>>, vector<16x32xf32>
    tpu.vector_store %arg4[%c0_9, %c0_10], %22 {strides = array<i32>} : memref<16x32xf32, #tpu.memory_space<vmem>>, vector<16x32xf32>,
    return
  }
  func.func @transform_0(%arg0: i32) -> (i32, i32) {
    %c0_i32 = arith.constant 0 : i32
    %c0_i32_0 = arith.constant 0 : i32
    return %arg0, %c0_i32 : i32, i32
  }
  func.func @transform_1(%arg0: i32) -> (i32, i32) {
    %c0_i32 = arith.constant 0 : i32
    %c0_i32_0 = arith.constant 0 : i32
    %c0_i32_1 = arith.constant 0 : i32
    return %c0_i32, %c0_i32_0 : i32, i32
  }
  func.func @transform_2(%arg0: i32) -> (i32, i32) {
    %c0_i32 = arith.constant 0 : i32
    %c0_i32_0 = arith.constant 0 : i32
    %c0_i32_1 = arith.constant 0 : i32
    return %c0_i32, %c0_i32_0 : i32, i32
  }
  func.func @transform_3(%arg0: i32) -> (i32, i32) {
    %c0_i32 = arith.constant 0 : i32
    %c0_i32_0 = arith.constant 0 : i32
    return %arg0, %c0_i32 : i32, i32
  }
}

</mosaic_0001>

<bundles_post_ra>
// kernel: token_norm.1
= control target key start
LH: loop header
LB: loop body
LE: loop exit
PB: predicated region body
PF: predicated region fallthrough
CT: control target
= control target key end

     0   :  { %8 = vsyncpa [#allocation3], 0  ;;  %s198_s0 = inlined_call_operand.hbm [shape: f32[16,32], index: 0, kind: input, shape index: {}]   ;;  %s199_s1 = inlined_call_operand.vmem [shape: f32[1,32], index: 1, kind: input, shape index: {}]   ;;  %s200_s2 = inlined_call_operand.vmem [shape: f32[1,32], index: 2, kind: input, shape index: {}]   ;;  %s201_s3 = inlined_call_operand.hbm [shape: f32[16,32], index: 3, kind: output, shape index: {}]  }
   0x1   :  { %9 = vsyncpa [#allocation4], 0  ;;  %s150_s12 = smov [#allocation2]  }
   0x2   :  { %s15_s13 = sshll.u32 %s150_s12, 4  ;;  %s16_s13 = int_to_ptr.vmem [resolvable:$true] %s15_s13 }
   0x3   :  { %s114_s14 = scalar_lea.vmem %s16_s13, 256  ;;  %p119_p1 = scmp.lt.s32.totalorder %s16_s13, %s16_s13 }
   0x4   :  { %p115_p0 = scmp.ne.s32.totalorder %s16_s13, %s114_s14  ;;  %p120_p2 = scmp.lt.s32.totalorder %s114_s14, %s114_s14 }
   0x6   :  { %p121_p3 = por %p120_p2, %p119_p1 }
   0x8   :  { %p122_p4 = pnand %p121_p3, %p115_p0 }
   0xa   :  { %125 = shalt.err (!%p122_p4)
}
   0xb   :  { %s151_s15 = smov 128   ;;  %s152_s16 = smov 8  }
   0xc   :  { %21 = dma.hbm_to_vmem [thread:$0]  %s198_s0, 256, %s16_s13, [#allocation3], %s151_s15, %s151_s15, %s152_s16  }
   0xd   :  { %146 = dma.done.wait [#allocation3], 256  }
   0xe   :  { %147 = vsyncadd [#allocation3], 4294967040  ;;  %vm31_vm0 = vcmask 261120   ;;  %v29_v0 = vld [vmem:[#allocation2] sm:$0xff]  ;;  %v30_v1 = vld [vmem:[#allocation2 + $0x8] sm:$0xff]  ;;  %s153_s22 = smov [#allocation5]  }
   0xf   :  { %v32_v2 = vsel %vm31_vm0, %v29_v0, 0.0  ;;  %v35_v3 = vsel %vm31_vm0, %v30_v1, 0.0  ;;  %v96_v20 = vld [vmem:[%s199_s1] ss:$0 sm:$0xff]  ;;  %s84_s23 = sshll.u32 %s153_s22, 4  ;;  %s85_s23 = int_to_ptr.vmem [resolvable:$true] %s84_s23 }
  0x10   :  { %33 = vadd.xlane.f32.xlu0 %v32_v2  ;;  %v97_v23 = vld [vmem:[%s200_s2] ss:$0 sm:$0xff]  ;;  %s126_s1 = scalar_lea.vmem %s85_s23, 256  ;;  %p131_p6 = scmp.lt.s32.totalorder %s85_s23, %s85_s23 }
  0x11   :  { %p127_p5 = scmp.ne.s32.totalorder %s85_s23, %s126_s1  ;;  %p132_p7 = scmp.lt.s32.totalorder %s126_s1, %s126_s1 }
  0x13   :  { %p133_p8 = por %p132_p7, %p131_p6 }
  0x14   :  { %36 = vadd.xlane.f32.xlu0 %v35_v3 }
  0x15   :  { %p134_p9 = pnand %p133_p8, %p127_p5 }
  0x99   :  { %v34_v4 = vpop.xlane.xlu0 %33 }
  0x9a   :  { %v39_v5 = vmul.f32 0.03125, %v34_v4 }
  0x9c   :  { %v41_v6 = vsub.f32 %v29_v0, %v39_v5 }
  0x9d   :  { %v37_v7 = vpop.xlane.xlu0 %36 }
  0x9e   :  { %v40_v8 = vmul.f32 0.03125, %v37_v7  ;;  %v43_v9 = vmul.f32 %v41_v6, %v41_v6 }
  0xa0   :  { %v42_v10 = vsub.f32 %v30_v1, %v40_v8  ;;  %v45_v11 = vsel %vm31_vm0, %v43_v9, 0.0 }
  0xa1   :  { %46 = vadd.xlane.f32.xlu1 %v45_v11 }
  0xa2   :  { %v44_v12 = vmul.f32 %v42_v10, %v42_v10 }
  0xa4   :  { %v48_v13 = vsel %vm31_vm0, %v44_v12, 0.0 }
  0xa5   :  { %49 = vadd.xlane.f32.xlu1 %v48_v13 }
 0x12a   :  { %v47_v14 = vpop.xlane.xlu1 %46 }
 0x12b   :  { %v51_v15 = vmul.f32 0.03125, %v47_v14 }
 0x12d   :  { %v53_v16 = vadd.f32 1e-05, %v51_v15 }
 0x12e   :  { %v50_v17 = vpop.xlane.xlu1 %49 }
 0x12f   :  { %102 = vrsqrt.f32 %v53_v16  ;;  %v52_v18 = vmul.f32 0.03125, %v50_v17 }
 0x131   :  { %v54_v19 = vadd.f32 1e-05, %v52_v18 }
 0x133   :  { %104 = vrsqrt.f32 %v54_v19 }
 0x13c   :  { %v103_v21 = vpop.eup %102 }
 0x13d   :  { %v64_v22 = vmul.f32 %v103_v21, %v96_v20 }
 0x13f   :  { %v66_v24 = vmul.f32 %v64_v22, %v41_v6 }
 0x140   :  { %v105_v25 = vpop.eup %104 }
 0x141   :  { %v65_v26 = vmul.f32 %v105_v25, %v96_v20  ;;  %v75_v27 = vadd.f32 %v97_v23, %v66_v24 }
 0x143   :  { %v67_v28 = vmul.f32 %v65_v26, %v42_v10  ;;  %77 = vst.msk [vmem:[#allocation5] sm:$0xff] %vm31_vm0, %v75_v27 }
 0x145   :  { %v76_v29 = vadd.f32 %v97_v23, %v67_v28 }
 0x147   :  { %78 = vst.msk [vmem:[#allocation5 + $0x8] sm:$0xff] %vm31_vm0, %v76_v29 }
 0x148   :  { %137 = shalt.err (!%p134_p9)
}
 0x149   :  { %90 = dma.vmem_to_hbm [thread:$0]  %s85_s23, 256, %s201_s3, [#allocation4], %s151_s15, %s151_s15, %s152_s16  }
 0x14a   :  { %148 = dma.done.wait [#allocation4], 256  }
 0x14b   :  { %149 = vsyncadd [#allocation4], 4294967040 }
 0x14c   :  { %94 = vsyncpa [#allocation3], 1 }
 0x14d   :  { %95 = vsyncpa [#allocation4], 1 }

</bundles_post_ra>
